<compile_context>
chip_gen: v6e
topology: v6e:2x2x1
jax: 0.10.0
libtpu: 0.0.40
codegen_flags: <defaults>
</compile_context>

<pallas_src>
import jax
import jax.numpy as jnp
from jax.experimental import pallas as pl
from jax.experimental.pallas import tpu as pltpu

EPS = 1e-5


def siamese_kernel(x_ref, w1_ref, p_ref, c2_ref, o_ref):
    # x_ref: (2B, IL) = [x1 ; x2] for ONE pair-batch (one grid step)
    # w1_ref: (IL, EMBED) bf16, already scaled by gamma1
    # p_ref: (2, EMBED) f32 = [b1_folded ; gamma2*w2]
    # c2_ref: (1, 1) f32 in SMEM = sum(beta2*w2) + b2
    B = o_ref.shape[0]
    x = x_ref[...]                                           # (2B, IL) f32

    # ---- embedder BN (affine folded into w1'/b1'): per-branch batch stats ----
    m1 = jnp.mean(x[:B], axis=0, keepdims=True)              # (1, IL)
    m2 = jnp.mean(x[B:], axis=0, keepdims=True)
    row = jax.lax.broadcasted_iota(jnp.int32, (2 * B, 1), 0)
    in_first = row < B                                       # (2B, 1)
    xc = x - jnp.where(in_first, m1, m2)                     # centered, no concat
    v1 = jnp.mean(xc[:B] ** 2, axis=0, keepdims=True)        # biased batch variance
    v2 = jnp.mean(xc[B:] ** 2, axis=0, keepdims=True)
    inv = jnp.where(in_first, jax.lax.rsqrt(v1 + EPS), jax.lax.rsqrt(v2 + EPS))
    h = xc * inv                                             # (2B, IL) normalized, f32

    # ---- one fused MXU matmul for both branches: bf16 operands, f32 accumulation ----
    # (param rows are (1,E) broadcasts; a stride-0 sublane-broadcast vld is an option
    #  once this lands inside a row-tiled grid.)
    b1f = p_ref[0:1, :]                                      # folded beta1@w1 + b1
    y = jnp.dot(h.astype(jnp.bfloat16), w1_ref[...],
                preferred_element_type=jnp.float32) + b1f
    y = jnp.maximum(y, 0.0)                                  # ReLU, f32 VPU

    d = jnp.abs(y[:B] - y[B:])                               # (B, EMBED)

    # ---- classifier: BN2 + Linear(EMBED->1), fully folded (no MXU, no full normalize) ----
    gw2 = p_ref[1:2, :]                                      # gamma2 * w2, (1, EMBED)
    m = jnp.mean(d, axis=0, keepdims=True)
    dc = d - m
    v = jnp.mean(dc ** 2, axis=0, keepdims=True)
    s = gw2 * jax.lax.rsqrt(v + EPS)                         # (1, EMBED), EUP rsqrt
    out = jnp.sum(dc * s, axis=-1, keepdims=True) + c2_ref[0, 0]
    o_ref[...] = out.astype(o_ref.dtype)


def _siamese_pallas(x_stacked, params, *, P, B):
    # x_stacked: (P*2B, IL); grid step p reads rows [2B*p, 2B*(p+1)) = [x1_p ; x2_p].
    IL = x_stacked.shape[1]
    EMBED = params["w1f_bf16"].shape[1]
    return pl.pallas_call(
        siamese_kernel,
        out_shape=jax.ShapeDtypeStruct((P * B, 1), jnp.float32),
        grid=(P,),
        in_specs=[
            pl.BlockSpec((2 * B, IL), lambda p: (p, 0)),           # per-step pair block
            pl.BlockSpec((IL, EMBED), lambda p: (0, 0)),           # resident bf16 weight
            pl.BlockSpec((2, EMBED), lambda p: (0, 0)),            # [b1'; gamma2*w2]
            pl.BlockSpec(memory_space=pltpu.MemorySpace.SMEM),     # folded scalar c2
        ],
        out_specs=pl.BlockSpec((B, 1), lambda p: (p, 0)),
        compiler_params=pltpu.CompilerParams(
            dimension_semantics=("parallel",)),                    # 2 TCs on v7x
    )(x_stacked, params["w1f_bf16"], params["p2"], params["c2"])


def siamese_forward(x1, x2, params):
    """Module-equivalent forward for one batch of B pairs: x1, x2 are (B, IL)."""
    B = x1.shape[0]
    x = jnp.concatenate([x1, x2], axis=0)                          # (2B, IL), stacked in wrapper
    return _siamese_pallas(x, params, P=1, B=B)


def siamese_forward_pairs(x1, x2, params):
    """Many independent pair-batches in ONE launch: x1, x2 are (P, B, IL).

    Each grid step evaluates training-mode BN with its own per-batch statistics."""
    P, B, IL = x1.shape
    x = jnp.concatenate([x1, x2], axis=1).reshape(P * 2 * B, IL)
    return _siamese_pallas(x, params, P=P, B=B).reshape(P, B, 1)


def init_params(key, il, embed, perturb_bn=True):
    k1, k2, k3, k4, k5, k6, k7, k8 = jax.random.split(key, 8)
    # PyTorch Linear init ~ U(-1/sqrt(fan_in), 1/sqrt(fan_in)); weights stored transposed.
    lim1 = 1.0 / jnp.sqrt(jnp.float32(il))
    lim2 = 1.0 / jnp.sqrt(jnp.float32(embed))
    w1 = jax.random.uniform(k1, (il, embed), jnp.float32, -lim1, lim1)   # = W1.T
    b1 = jax.random.uniform(k2, (embed,), jnp.float32, -lim1, lim1)
    w2 = jax.random.uniform(k3, (embed, 1), jnp.float32, -lim2, lim2)    # = W2.T
    b2 = jax.random.uniform(k4, (), jnp.float32, -lim2, lim2)
    if perturb_bn:
        # Non-default BN affine values so the offline folding algebra is actually
        # exercised; a fresh PyTorch BatchNorm1d has gamma=1, beta=0 (perturb_bn=False).
        g1 = 1.0 + 0.1 * jax.random.normal(k5, (il,), jnp.float32)
        be1 = 0.1 * jax.random.normal(k6, (il,), jnp.float32)
        g2 = 1.0 + 0.1 * jax.random.normal(k7, (embed,), jnp.float32)
        be2 = 0.1 * jax.random.normal(k8, (embed,), jnp.float32)
    else:
        g1 = jnp.ones((il,), jnp.float32); be1 = jnp.zeros((il,), jnp.float32)
        g2 = jnp.ones((embed,), jnp.float32); be2 = jnp.zeros((embed,), jnp.float32)

    # ---- offline folding of all static affine terms ----
    w1f = g1[:, None] * w1                          # BN1 gamma folded into the weight
    b1f = be1 @ w1 + b1                             # BN1 beta + linear bias
    gw2 = g2 * w2[:, 0]                             # BN2 gamma folded into classifier w
    c2 = jnp.sum(be2 * w2[:, 0]) + b2               # BN2 beta + classifier bias (scalar)

    return {
        # kernel inputs (3 VMEM arrays + 1 SMEM scalar)
        "w1f_bf16": w1f.astype(jnp.bfloat16),
        "p2": jnp.stack([b1f, gw2], axis=0),        # (2, EMBED) f32
        "c2": c2.reshape(1, 1),                     # (1, 1) f32 -> SMEM
        # unfolded f32 copies for the references
        "g1": g1[None, :], "be1": be1[None, :], "w1": w1, "b1": b1[None, :],
        "g2": g2[None, :], "be2": be2[None, :], "w2": w2, "b2": b2.reshape(1, 1),
        "b1f": b1f[None, :], "gw2": gw2[None, :],
    }


def reference_forward_f32(x1, x2, p):
    # Exact PyTorch training-mode forward semantics (unfolded), all f32.
    def bn(x, g, b):
        m = jnp.mean(x, axis=0, keepdims=True)
        v = jnp.mean((x - m) ** 2, axis=0, keepdims=True)
        return (x - m) * jax.lax.rsqrt(v + EPS) * g + b
    def embed(x):
        return jnp.maximum(bn(x, p["g1"], p["be1"]) @ p["w1"] + p["b1"], 0.0)
    d = jnp.abs(embed(x1) - embed(x2))
    return bn(d, p["g2"], p["be2"]) @ p["w2"] + p["b2"]


def reference_forward_bf16_mm(x1, x2, p):
    # Mirrors the kernel's folded math and bf16-operand / f32-accumulate matmul.
    def norm(x):
        m = jnp.mean(x, axis=0, keepdims=True)
        v = jnp.mean((x - m) ** 2, axis=0, keepdims=True)
        return (x - m) * jax.lax.rsqrt(v + EPS)
    B = x1.shape[0]
    h = jnp.concatenate([norm(x1), norm(x2)], axis=0).astype(jnp.bfloat16)
    y = jnp.dot(h, p["w1f_bf16"], preferred_element_type=jnp.float32) + p["b1f"]
    y = jnp.maximum(y, 0.0)
    d = jnp.abs(y[:B] - y[B:])
    m = jnp.mean(d, axis=0, keepdims=True)
    dc = d - m
    v = jnp.mean(dc ** 2, axis=0, keepdims=True)
    s = p["gw2"] * jax.lax.rsqrt(v + EPS)
    return jnp.sum(dc * s, axis=-1, keepdims=True) + p["c2"]


if __name__ == "__main__":
    B, IL, EMBED, P = 8, 32, 32, 4
    kx1, kx2, kp, kx3, kx4 = jax.random.split(jax.random.PRNGKey(0), 5)
    x1 = jax.random.normal(kx1, (B, IL), jnp.float32)
    x2 = jax.random.normal(kx2, (B, IL), jnp.float32)
    params = init_params(kp, IL, EMBED)

    # --- single pair-batch (module-equivalent forward) ---
    out = jax.block_until_ready(siamese_forward(x1, x2, params))
    assert out.shape == (B, 1)
    ref_bf16 = reference_forward_bf16_mm(x1, x2, params)
    assert jnp.allclose(out, ref_bf16, atol=2e-3, rtol=2e-3), (out, ref_bf16)
    ref_f32 = reference_forward_f32(x1, x2, params)
    assert jnp.allclose(out, ref_f32, atol=5e-2, rtol=5e-2), (out, ref_f32)

    # --- P independent pair-batches amortized over one launch (parallel grid axis) ---
    x1p = jax.random.normal(kx3, (P, B, IL), jnp.float32)
    x2p = jax.random.normal(kx4, (P, B, IL), jnp.float32)
    outp = jax.block_until_ready(siamese_forward_pairs(x1p, x2p, params))
    assert outp.shape == (P, B, 1)
    refp = jnp.stack([reference_forward_bf16_mm(x1p[i], x2p[i], params) for i in range(P)])
    assert jnp.allclose(outp, refp, atol=2e-3, rtol=2e-3), (outp, refp)

    # TODO(synk): BatchNorm running-stat (momentum) updates, the Adam optimizer and the
    # ReduceLROnPlateau scheduler are training-time state, not part of the forward kernel.
    print("KERNEL_OK")
</pallas_src>

<mosaic_0001>
module attributes {stable_mosaic.version = 11 : i64} {
  func.func @siamese_kernel(%arg0: i32, %arg1: memref<16x32xf32, #tpu.memory_space<vmem>>, %arg2: memref<32x32xbf16, #tpu.memory_space<vmem>>, %arg3: memref<2x32xf32, #tpu.memory_space<vmem>>, %arg4: memref<1x1xf32, #tpu.memory_space<smem>>, %arg5: memref<8x1xf32, #tpu.memory_space<vmem>>) attributes {dimension_semantics = [#tpu.dimension_semantics<parallel>], iteration_bounds = array<i64: 1>, scalar_prefetch = 0 : i64, scratch_operands = 0 : i64, tpu.core_type = #tpu.core_type<tc>, window_params = [{transform_indices = @transform_0, window_bounds = array<i64: 16, 32>}, {pipeline_mode = #tpu.pipeline_mode<synchronous>, transform_indices = @transform_1, window_bounds = array<i64: 32, 32>}, {pipeline_mode = #tpu.pipeline_mode<synchronous>, transform_indices = @transform_2, window_bounds = array<i64: 2, 32>}, {transform_indices = @transform_3, window_bounds = array<i64: 1, 1>}, {transform_indices = @transform_4, window_bounds = array<i64: 8, 1>}]} {
    %c0 = arith.constant 0 : index
    %c0_0 = arith.constant 0 : index
    %0 = vector.load %arg1[%c0, %c0_0] : memref<16x32xf32, #tpu.memory_space<vmem>>, vector<16x32xf32>
    %1 = vector.extract_strided_slice %0 {offsets = [0, 0], sizes = [8, 32], strides = [1, 1]} : vector<16x32xf32> to vector<8x32xf32>
    %cst = arith.constant dense<0.000000e+00> : vector<32xf32>
    %2 = vector.multi_reduction <add>, %1, %cst [0] : vector<8x32xf32> to vector<32xf32>
    %3 = vector.shape_cast %2 : vector<32xf32> to vector<1x32xf32>
    %cst_1 = arith.constant 8.000000e+00 : f32
    %4 = vector.broadcast %cst_1 : f32 to vector<1x32xf32>
    %5 = arith.divf %3, %4 : vector<1x32xf32>
    %6 = vector.extract_strided_slice %0 {offsets = [8, 0], sizes = [8, 32], strides = [1, 1]} : vector<16x32xf32> to vector<8x32xf32>
    %cst_2 = arith.constant dense<0.000000e+00> : vector<32xf32>
    %7 = vector.multi_reduction <add>, %6, %cst_2 [0] : vector<8x32xf32> to vector<32xf32>
    %8 = vector.shape_cast %7 : vector<32xf32> to vector<1x32xf32>
    %cst_3 = arith.constant 8.000000e+00 : f32
    %9 = vector.broadcast %cst_3 : f32 to vector<1x32xf32>
    %10 = arith.divf %8, %9 : vector<1x32xf32>
    %11 = tpu.iota {dimensions = array<i32: 0>} : vector<16x1xi32>
    %c8_i32 = arith.constant 8 : i32
    %12 = vector.broadcast %c8_i32 : i32 to vector<16x1xi32>
    %13 = arith.cmpi slt, %11, %12 : vector<16x1xi32>
    %14 = vector.shape_cast %13 : vector<16x1xi1> to vector<16x1xi1>
    %15 = vector.broadcast %14 : vector<16x1xi1> to vector<16x32xi1>
    %16 = vector.shape_cast %5 : vector<1x32xf32> to vector<1x32xf32>
    %17 = vector.broadcast %16 : vector<1x32xf32> to vector<16x32xf32>
    %18 = vector.shape_cast %10 : vector<1x32xf32> to vector<1x32xf32>
    %19 = vector.broadcast %18 : vector<1x32xf32> to vector<16x32xf32>
    %20 = arith.select %15, %17, %19 : vector<16x32xi1>, vector<16x32xf32>
    %21 = arith.subf %0, %20 : vector<16x32xf32>
    %22 = vector.extract_strided_slice %21 {offsets = [0, 0], sizes = [8, 32], strides = [1, 1]} : vector<16x32xf32> to vector<8x32xf32>
    %23 = arith.mulf %22, %22 : vector<8x32xf32>
    %cst_4 = arith.constant dense<0.000000e+00> : vector<32xf32>
    %24 = vector.multi_reduction <add>, %23, %cst_4 [0] : vector<8x32xf32> to vector<32xf32>
    %25 = vector.shape_cast %24 : vector<32xf32> to vector<1x32xf32>
    %cst_5 = arith.constant 8.000000e+00 : f32
    %26 = vector.broadcast %cst_5 : f32 to vector<1x32xf32>
    %27 = arith.divf %25, %26 : vector<1x32xf32>
    %28 = vector.extract_strided_slice %21 {offsets = [8, 0], sizes = [8, 32], strides = [1, 1]} : vector<16x32xf32> to vector<8x32xf32>
    %29 = arith.mulf %28, %28 : vector<8x32xf32>
    %cst_6 = arith.constant dense<0.000000e+00> : vector<32xf32>
    %30 = vector.multi_reduction <add>, %29, %cst_6 [0] : vector<8x32xf32> to vector<32xf32>
    %31 = vector.shape_cast %30 : vector<32xf32> to vector<1x32xf32>
    %cst_7 = arith.constant 8.000000e+00 : f32
    %32 = vector.broadcast %cst_7 : f32 to vector<1x32xf32>
    %33 = arith.divf %31, %32 : vector<1x32xf32>
    %cst_8 = arith.constant 9.99999974E-6 : f32
    %34 = vector.broadcast %cst_8 : f32 to vector<1x32xf32>
    %35 = arith.addf %27, %34 : vector<1x32xf32>
    %36 = math.rsqrt %35 : vector<1x32xf32>
    %cst_9 = arith.constant 9.99999974E-6 : f32
    %37 = vector.broadcast %cst_9 : f32 to vector<1x32xf32>
    %38 = arith.addf %33, %37 : vector<1x32xf32>
    %39 = math.rsqrt %38 : vector<1x32xf32>
    %40 = vector.shape_cast %13 : vector<16x1xi1> to vector<16x1xi1>
    %41 = vector.broadcast %40 : vector<16x1xi1> to vector<16x32xi1>
    %42 = vector.shape_cast %36 : vector<1x32xf32> to vector<1x32xf32>
    %43 = vector.broadcast %42 : vector<1x32xf32> to vector<16x32xf32>
    %44 = vector.shape_cast %39 : vector<1x32xf32> to vector<1x32xf32>
    %45 = vector.broadcast %44 : vector<1x32xf32> to vector<16x32xf32>
    %46 = arith.select %41, %43, %45 : vector<16x32xi1>, vector<16x32xf32>
    %47 = arith.mulf %21, %46 : vector<16x32xf32>
    %c0_10 = arith.constant 0 : index
    %c0_11 = arith.constant 0 : index
    %48 = vector.load %arg3[%c0_10, %c0_11] : memref<2x32xf32, #tpu.memory_space<vmem>>, vector<1x32xf32>
    %49 = arith.truncf %47 : vector<16x32xf32> to vector<16x32xbf16>
    %c0_12 = arith.constant 0 : index
    %c0_13 = arith.constant 0 : index
    %50 = vector.load %arg2[%c0_12, %c0_13] : memref<32x32xbf16, #tpu.memory_space<vmem>>, vector<32x32xbf16>
    %cst_14 = arith.constant dense<0.000000e+00> : vector<16x32xf32>
    %51 = tpu.matmul %49, %50, %cst_14 {dimension_numbers = #tpu.dot_dimension_numbers<[1], [0], [0], [1], [0, 0, 1, 1], [], []>} : vector<16x32xbf16>, vector<32x32xbf16>, vector<16x32xf32> -> vector<16x32xf32>
    %52 = vector.broadcast %48 : vector<1x32xf32> to vector<16x32xf32>
    %53 = arith.addf %51, %52 : vector<16x32xf32>
    %cst_15 = arith.constant 0.000000e+00 : f32
    %54 = vector.broadcast %cst_15 : f32 to vector<16x32xf32>
    %55 = arith.maximumf %53, %54 : vector<16x32xf32>
    %56 = vector.extract_strided_slice %55 {offsets = [0, 0], sizes = [8, 32], strides = [1, 1]} : vector<16x32xf32> to vector<8x32xf32>
    %57 = vector.extract_strided_slice %55 {offsets = [8, 0], sizes = [8, 32], strides = [1, 1]} : vector<16x32xf32> to vector<8x32xf32>
    %58 = arith.subf %56, %57 : vector<8x32xf32>
    %59 = math.absf %58 : vector<8x32xf32>
    %c1 = arith.constant 1 : index
    %c0_16 = arith.constant 0 : index
    %60 = vector.load %arg3[%c1, %c0_16] : memref<2x32xf32, #tpu.memory_space<vmem>>, vector<1x32xf32>
    %cst_17 = arith.constant dense<0.000000e+00> : vector<32xf32>
    %61 = vector.multi_reduction <add>, %59, %cst_17 [0] : vector<8x32xf32> to vector<32xf32>
    %62 = vector.shape_cast %61 : vector<32xf32> to vector<1x32xf32>
    %cst_18 = arith.constant 8.000000e+00 : f32
    %63 = vector.broadcast %cst_18 : f32 to vector<1x32xf32>
    %64 = arith.divf %62, %63 : vector<1x32xf32>
    %65 = vector.broadcast %64 : vector<1x32xf32> to vector<8x32xf32>
    %66 = arith.subf %59, %65 : vector<8x32xf32>
    %67 = arith.mulf %66, %66 : vector<8x32xf32>
    %cst_19 = arith.constant dense<0.000000e+00> : vector<32xf32>
    %68 = vector.multi_reduction <add>, %67, %cst_19 [0] : vector<8x32xf32> to vector<32xf32>
    %69 = vector.shape_cast %68 : vector<32xf32> to vector<1x32xf32>
    %cst_20 = arith.constant 8.000000e+00 : f32
    %70 = vector.broadcast %cst_20 : f32 to vector<1x32xf32>
    %71 = arith.divf %69, %70 : vector<1x32xf32>
    %cst_21 = arith.constant 9.99999974E-6 : f32
    %72 = vector.broadcast %cst_21 : f32 to vector<1x32xf32>
    %73 = arith.addf %71, %72 : vector<1x32xf32>
    %74 = math.rsqrt %73 : vector<1x32xf32>
    %75 = arith.mulf %60, %74 : vector<1x32xf32>
    %76 = vector.broadcast %75 : vector<1x32xf32> to vector<8x32xf32>
    %77 = arith.mulf %66, %76 : vector<8x32xf32>
    %cst_22 = arith.constant dense<0.000000e+00> : vector<8xf32>
    %78 = vector.multi_reduction <add>, %77, %cst_22 [1] : vector<8x32xf32> to vector<8xf32>
    %79 = vector.shape_cast %78 : vector<8xf32> to vector<8x1xf32>
    %c0_23 = arith.constant 0 : index
    %c0_24 = arith.constant 0 : index
    %80 = memref.load %arg4[%c0_23, %c0_24] : memref<1x1xf32, #tpu.memory_space<smem>>
    %81 = vector.broadcast %80 : f32 to vector<8x1xf32>
    %82 = arith.addf %79, %81 : vector<8x1xf32>
    %c0_25 = arith.constant 0 : index
    %c0_26 = arith.constant 0 : index
    %83 = vector.load %arg5[%c0_25, %c0_26] : memref<8x1xf32, #tpu.memory_space<vmem>>, vector<8x1xf32>
    tpu.vector_store %arg5[%c0_25, %c0_26], %82 {strides = array<i32>} : memref<8x1xf32, #tpu.memory_space<vmem>>, vector<8x1xf32>,
    return
  }
  func.func @transform_0(%arg0: i32) -> (i32, i32) {
    %c0_i32 = arith.constant 0 : i32
    %c0_i32_0 = arith.constant 0 : i32
    return %arg0, %c0_i32 : i32, i32
  }
  func.func @transform_1(%arg0: i32) -> (i32, i32) {
    %c0_i32 = arith.constant 0 : i32
    %c0_i32_0 = arith.constant 0 : i32
    %c0_i32_1 = arith.constant 0 : i32
    return %c0_i32, %c0_i32_0 : i32, i32
  }
  func.func @transform_2(%arg0: i32) -> (i32, i32) {
    %c0_i32 = arith.constant 0 : i32
    %c0_i32_0 = arith.constant 0 : i32
    %c0_i32_1 = arith.constant 0 : i32
    return %c0_i32, %c0_i32_0 : i32, i32
  }
  func.func @transform_3(%arg0: i32) -> (i32, i32) {
    %c0_i32 = arith.constant 0 : i32
    %c0_i32_0 = arith.constant 0 : i32
    %c0_i32_1 = arith.constant 0 : i32
    return %c0_i32, %c0_i32_0 : i32, i32
  }
  func.func @transform_4(%arg0: i32) -> (i32, i32) {
    %c0_i32 = arith.constant 0 : i32
    %c0_i32_0 = arith.constant 0 : i32
    return %arg0, %c0_i32 : i32, i32
  }
}

</mosaic_0001>

<bundles_post_ra>
// kernel: tpu_custom_call.1
= control target key start
LH: loop header
LB: loop body
LE: loop exit
PB: predicated region body
PF: predicated region fallthrough
CT: control target
= control target key end

     0   :  { %10 = vsyncpa [#allocation4], 0  ;;  %s351_s0 = inlined_call_operand.hbm [shape: f32[16,32], index: 0, kind: input, shape index: {}]   ;;  %s352_s1 = inlined_call_operand.hbm [shape: bf16[32,32], index: 1, kind: input, shape index: {}]   ;;  %s353_s2 = inlined_call_operand.vmem [shape: f32[2,32], index: 2, kind: input, shape index: {}]   ;;  %s354_s3 = inlined_call_operand.<no memory space> [shape: f32[1,1], index: 3, kind: input, shape index: {}]   ;;  %s355_s4 = inlined_call_operand.vmem [shape: f32[8,1], index: 4, kind: output, shape index: {}]  }
   0x1   :  { %11 = vsyncpa [#allocation6], 0  ;;  %s292_s15 = smov [#allocation3]  }
   0x2   :  { %s17_s16 = sshll.u32 %s292_s15, 4  ;;  %s18_s16 = int_to_ptr.vmem [resolvable:$true] %s17_s16 }
   0x3   :  { %s256_s17 = scalar_lea.vmem %s18_s16, 256  ;;  %p261_p1 = scmp.lt.s32.totalorder %s18_s16, %s18_s16 }
   0x4   :  { %p257_p0 = scmp.ne.s32.totalorder %s18_s16, %s256_s17  ;;  %p262_p2 = scmp.lt.s32.totalorder %s256_s17, %s256_s17 }
   0x6   :  { %p263_p3 = por %p262_p2, %p261_p1 }
   0x8   :  { %p264_p4 = pnand %p263_p3, %p257_p0 }
   0xa   :  { %267 = shalt.err (!%p264_p4)
}
   0xb   :  { %s293_s18 = smov 128   ;;  %s294_s19 = smov 8  }
   0xc   :  { %23 = dma.hbm_to_vmem [thread:$0]  %s351_s0, 256, %s18_s16, [#allocation4], %s293_s18, %s293_s18, %s294_s19  }
   0xd   :  { %s295_s22 = smov [#allocation5]  }
   0xe   :  { %s29_s23 = sshll.u32 %s295_s22, 4  ;;  %s30_s23 = int_to_ptr.vmem [resolvable:$true] %s29_s23 }
   0xf   :  { %s276_s24 = scalar_lea.vmem %s30_s23, 256  ;;  %p281_p6 = scmp.lt.s32.totalorder %s30_s23, %s30_s23 }
  0x10   :  { %p277_p5 = scmp.ne.s32.totalorder %s30_s23, %s276_s24  ;;  %p282_p7 = scmp.lt.s32.totalorder %s276_s24, %s276_s24 }
  0x12   :  { %p283_p8 = por %p282_p7, %p281_p6 }
  0x14   :  { %p284_p9 = pnand %p283_p8, %p277_p5 }
  0x16   :  { %287 = shalt.err (!%p284_p9)
}
  0x17   :  { %s296_s25 = smov 64   ;;  %s297_s26 = smov 4  }
  0x18   :  { %35 = dma.hbm_to_vmem [thread:$0]  %s352_s1, 256, %s30_s23, [#allocation6], %s296_s25, %s296_s25, %s297_s26  }
  0x19   :  { %288 = dma.done.wait [#allocation4], 256  }
  0x1a   :  { %289 = vsyncadd [#allocation4], 4294967040 }
  0x1b   :  { %290 = dma.done.wait [#allocation6], 256  }
  0x1c   :  { %291 = vsyncadd [#allocation6], 4294967040  ;;  %v298_v0 = vmov 0.0   ;;  %vm299_vm0 = vmmov 0   ;;  %v240_v1 = vld [vmem:[#allocation5 + $0x8] sm:$0xff]   ;;  %vm49_vm1 = vcmask 261120  }
  0x1d   :  { %224 = vmatprep.subr.bf16.mxu0 %v298_v0  ;;  %228 = vmatprep.mubr.msk.bf16.mxu0 %vm299_vm0, %v298_v0  ;;  %v241_v2 = vld [vmem:[#allocation5] sm:$0xff]   ;;  %v47_v3 = vld [vmem:[#allocation3] sm:$0xff]  ;;  %v48_v4 = vld [vmem:[#allocation3 + $0x8] sm:$0xff]  ;;  %vm209_vm2 = vcmask 7168  }
  0x1e   :  { %225 = vmatpush3.bf16.msra.mxu0 %v240_v1  ;;  %v50_v5 = vsel %vm49_vm1, %v47_v3, 0.0  ;;  %v59_v6 = vsel %vm49_vm1, %v48_v4, 0.0  ;;  %v217_v48 = vld [vmem:[%s353_s2] ss:$0 sm:$0xff] }
  0x1f   :  { %226 = vmatprep.subr.bf16.mxu0 %v298_v0  ;;  %v51_v7 = vrot.slane %v50_v5, 4  ;;  %v60_v8 = vrot.slane %v59_v6, 4 }
  0x21   :  { %v52_v9 = vadd.f32 %v51_v7, %v50_v5  ;;  %v61_v10 = vadd.f32 %v60_v8, %v59_v6 }
  0x22   :  { %227 = vmatpush3.bf16.msra.mxu0 %v241_v2 }
  0x23   :  { %v53_v11 = vrot.slane %v52_v9, 2  ;;  %v62_v12 = vrot.slane %v61_v10, 2 }
  0x25   :  { %v54_v13 = vadd.f32 %v53_v11, %v52_v9  ;;  %v63_v14 = vadd.f32 %v62_v12, %v61_v10 }
  0x27   :  { %v55_v15 = vrot.slane %v54_v13, 1  ;;  %v64_v16 = vrot.slane %v63_v14, 1 }
  0x29   :  { %v56_v17 = vadd.f32 %v55_v15, %v54_v13  ;;  %v65_v18 = vadd.f32 %v64_v16, %v63_v14  ;;  %v198_v14 = vlaneseq  ;;  %v176_v16 = vld [vmem:[%s353_s2 + $0x1] sm:$0x1] }
  0x2b   :  { %v58_v19 = vmul.f32 0.125, %v56_v17  ;;  %v66_v20 = vmul.f32 0.125, %v65_v18  ;;  %v199_v15 = vshrl.u32 %v198_v14, 7 }
  0x2d   :  { %v78_v21 = vsub.f32 %v47_v3, %v58_v19  ;;  %v79_v22 = vsub.f32 %v48_v4, %v66_v20  ;;  %v200_v17 = vsub.s32 0, %v199_v15 }
  0x2f   :  { %v80_v23 = vmul.f32 %v78_v21, %v78_v21  ;;  %v89_v24 = vmul.f32 %v79_v22, %v79_v22 }
  0x31   :  { %v81_v25 = vsel %vm49_vm1, %v80_v23, 0.0  ;;  %v90_v26 = vsel %vm49_vm1, %v89_v24, 0.0  ;;  %v207_v23 = vstv %s354_s3 }
  0x32   :  { %v82_v27 = vrot.slane %v81_v25, 4  ;;  %v91_v28 = vrot.slane %v90_v26, 4 }
  0x34   :  { %v83_v29 = vadd.f32 %v82_v27, %v81_v25  ;;  %v92_v30 = vadd.f32 %v91_v28, %v90_v26 }
  0x36   :  { %v84_v31 = vrot.slane %v83_v29, 2  ;;  %v93_v32 = vrot.slane %v92_v30, 2 }
  0x38   :  { %v85_v33 = vadd.f32 %v84_v31, %v83_v29  ;;  %v94_v34 = vadd.f32 %v93_v32, %v92_v30 }
  0x3a   :  { %v86_v35 = vrot.slane %v85_v33, 1  ;;  %v95_v36 = vrot.slane %v94_v34, 1 }
  0x3c   :  { %v87_v37 = vadd.f32 %v86_v35, %v85_v33  ;;  %v96_v38 = vadd.f32 %v95_v36, %v94_v34 }
  0x3e   :  { %v88_v39 = vmul.f32 0.125, %v87_v37  ;;  %v97_v40 = vmul.f32 0.125, %v96_v38 }
  0x40   :  { %v98_v41 = vadd.f32 1e-05, %v88_v39  ;;  %v100_v42 = vadd.f32 1e-05, %v97_v40 }
  0x42   :  { %242 = vrsqrt.f32 %v98_v41 }
  0x43   :  { %244 = vrsqrt.f32 %v100_v42 }
  0x4f   :  { %v243_v43 = vpop.eup %242 }
  0x50   :  { %v245_v44 = vpop.eup %244  ;;  %v104_v45 = vmul.f32 %v243_v43, %v78_v21 }
  0x51   :  { %v105_v46 = vmul.f32 %v245_v44, %v79_v22 }
  0x53   :  { %v107_v47 = vpack.c.bf16 %v105_v46, %v104_v45 }
  0x55   :  { %229 = vmatmul.mubr.msk.bf16.vlgmr.msra.gmra.mxu0 %vm49_vm1, %v107_v47 }
 0x115   :  { %v165_v49 = vpop.f32.mrf.mxu0 }
 0x116   :  { %v166_v51 = vadd.f32 %v217_v48, %v165_v49 }
 0x117   :  { %v230_v50 = vpop.f32.mrf.mxu0 }
 0x118   :  { %v172_v55 = vmax.f32 %v166_v51, 0.0 }
 0x119   :  { %v168_v52 = vpop.f32.mrf.mxu0 }
 0x11a   :  { %v169_v53 = vadd.f32 %v217_v48, %v168_v52 }
 0x11b   :  { %v231_v54 = vpop.f32.mrf.mxu0 }
 0x11c   :  { %v173_v56 = vmax.f32 %v169_v53, 0.0 }
 0x11e   :  { %v174_v57 = vsub.f32 %v172_v55, %v173_v56 }
 0x120   :  { %v175_v58 = vand.u32 2147483647, %v174_v57 }
 0x122   :  { %v177_v59 = vsel %vm49_vm1, %v175_v58, 0.0 }
 0x123   :  { %v178_v60 = vrot.slane %v177_v59, 4 }
 0x125   :  { %v179_v61 = vadd.f32 %v178_v60, %v177_v59 }
 0x127   :  { %v180_v62 = vrot.slane %v179_v61, 2 }
 0x129   :  { %v181_v63 = vadd.f32 %v180_v62, %v179_v61 }
 0x12b   :  { %v182_v0 = vrot.slane %v181_v63, 1 }
 0x12d   :  { %v183_v1 = vadd.f32 %v182_v0, %v181_v63 }
 0x12f   :  { %v184_v2 = vmul.f32 0.125, %v183_v1 }
 0x131   :  { %v185_v3 = vsub.f32 %v175_v58, %v184_v2 }
 0x133   :  { %v186_v4 = vmul.f32 %v185_v3, %v185_v3 }
 0x135   :  { %v187_v5 = vsel %vm49_vm1, %v186_v4, 0.0 }
 0x136   :  { %v188_v6 = vrot.slane %v187_v5, 4 }
 0x138   :  { %v189_v7 = vadd.f32 %v188_v6, %v187_v5 }
 0x13a   :  { %v190_v8 = vrot.slane %v189_v7, 2 }
 0x13c   :  { %v191_v9 = vadd.f32 %v190_v8, %v189_v7 }
 0x13e   :  { %v192_v10 = vrot.slane %v191_v9, 1 }
 0x140   :  { %v193_v11 = vadd.f32 %v192_v10, %v191_v9 }
 0x142   :  { %v194_v12 = vmul.f32 0.125, %v193_v11 }
 0x144   :  { %v195_v13 = vadd.f32 1e-05, %v194_v12 }
 0x146   :  { %246 = vrsqrt.f32 %v195_v13 }
 0x153   :  { %v247_v18 = vpop.eup %246 }
 0x154   :  { %v197_v19 = vmul.f32 %v247_v18, %v176_v16 }
 0x156   :  { %v201_v20 = vrot.slane %v197_v19, %v200_v17 }
 0x158   :  { %v202_v21 = vmul.f32 %v201_v20, %v185_v3 }
 0x15a   :  { %v203_v22 = vsel %vm49_vm1, %v202_v21, 0.0 }
 0x15b   :  { %204 = vadd.xlane.f32.xlu0 %v203_v22 }
 0x1e4   :  { %v205_v24 = vpop.xlane.xlu0 %204 }
 0x1e5   :  { %v208_v25 = vadd.f32 %v207_v23, %v205_v24 }
 0x1e7   :  { %210 = vst.msk [vmem:[%s355_s4] sm:$0xff] %vm209_vm2, %v208_v25 }
 0x1e8   :  { %215 = vsyncpa [#allocation4], 1 }
 0x1e9   :  { %216 = vsyncpa [#allocation6], 1 }

</bundles_post_ra>
